<compile_context>
chip_gen: v7x
topology: tpu7x:2x2x1
jax: 0.10.0
libtpu: 0.0.40
codegen_flags: <defaults>
</compile_context>

<pallas_src>
import functools

import jax
import jax.numpy as jnp
import numpy as np
from jax.experimental import pallas as pl
from jax.experimental.pallas import tpu as pltpu

# tap order must match the weight-slab column groups: t = kh*3 + kw
_OFFS = tuple((kh - 1, kw - 1) for kh in range(3) for kw in range(3))


def _round_up8(n):
    return ((n + 7) // 8) * 8


def _unet_block_kernel(x_ref, w1_ref, b1_ref, w2_ref, b2_ref, mask_ref,
                       sel_ref, out_ref, *, H, W):
    # x_ref   : (1, Cin_p, H*W)    one image, channels zero-padded to mult. of 8
    # w1_ref  : (Cmid_p, 9*Cin_p)  conv1 slab, column = (kh*3+kw)*Cin_p + ci
    # b1_ref  : (Cmid_p, 1)
    # w2_ref  : (Cout, 9*Cmid_p)   conv2 slab
    # b2_ref  : (Cout, 1)
    # mask_ref: (9, H*W)           per-tap 0/1 border-validity masks
    # sel_ref : (H*W, Hh*Wh)       0/1 lane-compaction matrix for the 2x2 pool
    # out_ref : (1, Cout, Hh*Wh)
    HW = H * W
    f32 = jnp.float32

    def conv3x3_relu(img, w_ref, b_ref):
        """img: (Cp, HW) spatial-in-lanes -> relu(conv3x3(img) + b): (Co, HW)."""
        rows = img.shape[0]
        zpad = jnp.zeros((rows, W + 1), f32)
        # lane-zero-padded copy: xe[:, W+1+f] == img[:, f] for f in [0, HW), 0 outside
        xe = jnp.concatenate([zpad, img, zpad], axis=1)        # (Cp, HW + 2W + 2)
        taps = []
        for t, (dh, dw) in enumerate(_OFFS):
            if dh == 0 and dw == 0:
                taps.append(img)
            else:
                s = dh * W + dw
                shifted = xe[:, W + 1 + s: W + 1 + s + HW]      # img[:, p + s], 0 if OOB
                taps.append(shifted * mask_ref[t:t + 1, :])     # kill row-wrap leakage
        patches = jnp.concatenate(taps, axis=0)                 # (9*Cp, HW), 8-row blocks
        acc = jnp.dot(w_ref[...], patches,
                      preferred_element_type=jnp.float32)       # (Co, HW), one MXU matmul
        return jnp.maximum(acc + b_ref[...], 0.0)

    x_img = x_ref[0].astype(f32)                                 # (Cin_p, HW)
    y1 = conv3x3_relu(x_img, w1_ref, b1_ref)                     # (Cmid_p, HW)
    y2 = conv3x3_relu(y1, w2_ref, b2_ref)                        # (Cout, HW)

    # ---- 2x2 / stride-2 maxpool, spatial-in-lanes ----
    cout = y2.shape[0]
    y2e = jnp.concatenate([y2, jnp.zeros((cout, 1), f32)], axis=1)
    m1 = jnp.maximum(y2, y2e[:, 1:HW + 1])                       # max over the w-pair
    m1e = jnp.concatenate([m1, jnp.zeros((cout, W), f32)], axis=1)
    m2 = jnp.maximum(m1, m1e[:, W:W + HW])                       # max over the h-pair
    # m2[:, 2i*W + 2j] is the pooled value; one tiny MXU matmul with the 0/1
    # selection matrix compacts those lanes into a dense (Cout, Hh*Wh) block.
    pooled = jnp.dot(m2, sel_ref[...], preferred_element_type=jnp.float32)
    out_ref[0] = pooled.astype(out_ref.dtype)


def unet_block_1(x_nchw, w1, b1, w2, b2):
    """Forward pass of Unet_block_1.  x_nchw: (B, Cin, H, W) float32, returns NCHW."""
    B, Cin, H, W = x_nchw.shape
    Cout = w1.shape[0]
    assert H % 2 == 0 and W % 2 == 0
    Hh, Wh = H // 2, W // 2
    HW, HWq = H * W, Hh * Wh
    Cin_p, Cmid_p = _round_up8(Cin), _round_up8(Cout)

    # NCHW -> (B, Cin_p, H*W): free reshape + small channel zero-pad; NO transposes.
    x_flat = x_nchw.reshape(B, Cin, HW).astype(jnp.float32)
    x_p = jnp.pad(x_flat, ((0, 0), (0, Cin_p - Cin), (0, 0)))

    # OIHW -> (Co, 9*Cp) slabs; column = (kh*3+kw)*Cp + ci; zero-padded channels.
    w1s = jnp.pad(jnp.transpose(w1, (0, 2, 3, 1)).astype(jnp.float32),
                  ((0, Cmid_p - Cout), (0, 0), (0, 0), (0, Cin_p - Cin)))
    w1s = w1s.reshape(Cmid_p, 9 * Cin_p)
    w2s = jnp.pad(jnp.transpose(w2, (0, 2, 3, 1)).astype(jnp.float32),
                  ((0, 0), (0, 0), (0, 0), (0, Cmid_p - Cout)))
    w2s = w2s.reshape(Cout, 9 * Cmid_p)
    b1r = jnp.pad(b1.astype(jnp.float32), (0, Cmid_p - Cout)).reshape(Cmid_p, 1)
    b2r = b2.astype(jnp.float32).reshape(Cout, 1)

    # Per-tap 0/1 border-validity masks (host-built, static).
    mask_np = np.zeros((9, H, W), np.float32)
    for t, (dh, dw) in enumerate(_OFFS):
        mask_np[t, max(0, -dh):H - max(0, dh), max(0, -dw):W - max(0, dw)] = 1.0
    masks = jnp.asarray(mask_np.reshape(9, HW))

    # 0/1 lane-compaction matrix: picks flat position 2i*W + 2j for output i*Wh + j.
    sel_np = np.zeros((HW, HWq), np.float32)
    q = np.arange(HWq)
    sel_np[2 * (q // Wh) * W + 2 * (q % Wh), q] = 1.0
    sel = jnp.asarray(sel_np)

    kernel = functools.partial(_unet_block_kernel, H=H, W=W)

    out_flat = pl.pallas_call(
        kernel,
        out_shape=jax.ShapeDtypeStruct((B, Cout, HWq), x_nchw.dtype),
        grid_spec=pltpu.PrefetchScalarGridSpec(
            num_scalar_prefetch=0,
            grid=(B,),
            in_specs=[
                pl.BlockSpec((1, Cin_p, HW), lambda b: (b, 0, 0)),
                pl.BlockSpec((Cmid_p, 9 * Cin_p), lambda b: (0, 0)),
                pl.BlockSpec((Cmid_p, 1), lambda b: (0, 0)),
                pl.BlockSpec((Cout, 9 * Cmid_p), lambda b: (0, 0)),
                pl.BlockSpec((Cout, 1), lambda b: (0, 0)),
                pl.BlockSpec((9, HW), lambda b: (0, 0)),
                pl.BlockSpec((HW, HWq), lambda b: (0, 0)),
            ],
            out_specs=pl.BlockSpec((1, Cout, HWq), lambda b: (b, 0, 0)),
        ),
        # Batch steps are independent -> v7x can split them across its two
        # TensorCores; neutral on single-TC v5e/v6e.
        compiler_params=pltpu.CompilerParams(
            dimension_semantics=("parallel",)),
    )(x_p, w1s, b1r, w2s, b2r, masks, sel)

    # (B, Cout, Hh*Wh) -> NCHW, a free reshape (no transpose).
    return out_flat.reshape(B, Cout, Hh, Wh)


def _reference(x_nchw, w1, b1, w2, b2):
    """Pure-JAX reference for correctness checking."""
    dn = ('NCHW', 'OIHW', 'NCHW')
    y = jax.lax.conv_general_dilated(x_nchw, w1, (1, 1), ((1, 1), (1, 1)),
                                     dimension_numbers=dn)
    y = jnp.maximum(y + b1[None, :, None, None], 0.0)
    y = jax.lax.conv_general_dilated(y, w2, (1, 1), ((1, 1), (1, 1)),
                                     dimension_numbers=dn)
    y = jnp.maximum(y + b2[None, :, None, None], 0.0)
    y = jax.lax.reduce_window(y, -jnp.inf, jax.lax.max,
                              (1, 1, 2, 2), (1, 1, 2, 2), 'VALID')
    return y


if __name__ == "__main__":
    B, in_c, out_c, H, W = 2, 4, 8, 16, 16

    key = jax.random.PRNGKey(0)
    kx, k1, k2, k3, k4 = jax.random.split(key, 5)

    x = jax.random.normal(kx, (B, in_c, H, W), jnp.float32)

    # Deterministic synthetic parameters (shapes from nn.Conv2d(in_c,out_c,3,pad=1)).
    w1 = jax.random.normal(k1, (out_c, in_c, 3, 3), jnp.float32) * 0.2
    b1 = jax.random.normal(k2, (out_c,), jnp.float32) * 0.1
    w2 = jax.random.normal(k3, (out_c, out_c, 3, 3), jnp.float32) * 0.2
    b2 = jax.random.normal(k4, (out_c,), jnp.float32) * 0.1

    out = unet_block_1(x, w1, b1, w2, b2)
    out = jax.block_until_ready(out)

    ref = _reference(x, w1, b1, w2, b2)
    np.testing.assert_allclose(np.asarray(out), np.asarray(ref),
                               rtol=1e-4, atol=1e-4)

    assert out.shape == (B, out_c, H // 2, W // 2)
    print("KERNEL_OK")
</pallas_src>

<mosaic_0001>
module attributes {stable_mosaic.version = 11 : i64} {
  func.func @_unet_block_kernel(%arg0: i32, %arg1: memref<1x8x256xf32, #tpu.memory_space<vmem>>, %arg2: memref<8x72xf32, #tpu.memory_space<vmem>>, %arg3: memref<8x1xf32, #tpu.memory_space<vmem>>, %arg4: memref<8x72xf32, #tpu.memory_space<vmem>>, %arg5: memref<8x1xf32, #tpu.memory_space<vmem>>, %arg6: memref<9x256xf32, #tpu.memory_space<vmem>>, %arg7: memref<256x64xf32, #tpu.memory_space<vmem>>, %arg8: memref<1x8x64xf32, #tpu.memory_space<vmem>>) attributes {dimension_semantics = [#tpu.dimension_semantics<parallel>], iteration_bounds = array<i64: 2>, scalar_prefetch = 0 : i64, scratch_operands = 0 : i64, tpu.core_type = #tpu.core_type<tc>, window_params = [{transform_indices = @transform_0, window_bounds = array<i64: 1, 8, 256>}, {pipeline_mode = #tpu.pipeline_mode<synchronous>, transform_indices = @transform_1, window_bounds = array<i64: 8, 72>}, {pipeline_mode = #tpu.pipeline_mode<synchronous>, transform_indices = @transform_2, window_bounds = array<i64: 8, 1>}, {pipeline_mode = #tpu.pipeline_mode<synchronous>, transform_indices = @transform_3, window_bounds = array<i64: 8, 72>}, {pipeline_mode = #tpu.pipeline_mode<synchronous>, transform_indices = @transform_4, window_bounds = array<i64: 8, 1>}, {pipeline_mode = #tpu.pipeline_mode<synchronous>, transform_indices = @transform_5, window_bounds = array<i64: 9, 256>}, {pipeline_mode = #tpu.pipeline_mode<synchronous>, transform_indices = @transform_6, window_bounds = array<i64: 256, 64>}, {transform_indices = @transform_7, window_bounds = array<i64: 1, 8, 64>}]} {
    %c0 = arith.constant 0 : index
    %c0_0 = arith.constant 0 : index
    %c0_1 = arith.constant 0 : index
    %0 = vector.load %arg1[%c0, %c0_0, %c0_1] : memref<1x8x256xf32, #tpu.memory_space<vmem>>, vector<1x8x256xf32>
    %1 = vector.shape_cast %0 : vector<1x8x256xf32> to vector<8x256xf32>
    %cst = arith.constant 0.000000e+00 : f32
    %2 = vector.broadcast %cst : f32 to vector<8x17xf32>
    %3 = tpu.concatenate %2, %1, %2 in 1 : vector<8x17xf32>, vector<8x256xf32>, vector<8x17xf32> -> vector<8x290xf32>
    %4 = vector.extract_strided_slice %3 {offsets = [0, 0], sizes = [8, 256], strides = [1, 1]} : vector<8x290xf32> to vector<8x256xf32>
    %c0_2 = arith.constant 0 : index
    %c0_3 = arith.constant 0 : index
    %5 = vector.load %arg6[%c0_2, %c0_3] : memref<9x256xf32, #tpu.memory_space<vmem>>, vector<1x256xf32>
    %6 = vector.broadcast %5 : vector<1x256xf32> to vector<8x256xf32>
    %7 = arith.mulf %4, %6 : vector<8x256xf32>
    %8 = vector.extract_strided_slice %3 {offsets = [0, 1], sizes = [8, 256], strides = [1, 1]} : vector<8x290xf32> to vector<8x256xf32>
    %c1 = arith.constant 1 : index
    %c0_4 = arith.constant 0 : index
    %9 = vector.load %arg6[%c1, %c0_4] : memref<9x256xf32, #tpu.memory_space<vmem>>, vector<1x256xf32>
    %10 = vector.broadcast %9 : vector<1x256xf32> to vector<8x256xf32>
    %11 = arith.mulf %8, %10 : vector<8x256xf32>
    %12 = vector.extract_strided_slice %3 {offsets = [0, 2], sizes = [8, 256], strides = [1, 1]} : vector<8x290xf32> to vector<8x256xf32>
    %c2 = arith.constant 2 : index
    %c0_5 = arith.constant 0 : index
    %13 = vector.load %arg6[%c2, %c0_5] : memref<9x256xf32, #tpu.memory_space<vmem>>, vector<1x256xf32>
    %14 = vector.broadcast %13 : vector<1x256xf32> to vector<8x256xf32>
    %15 = arith.mulf %12, %14 : vector<8x256xf32>
    %16 = vector.extract_strided_slice %3 {offsets = [0, 16], sizes = [8, 256], strides = [1, 1]} : vector<8x290xf32> to vector<8x256xf32>
    %c3 = arith.constant 3 : index
    %c0_6 = arith.constant 0 : index
    %17 = vector.load %arg6[%c3, %c0_6] : memref<9x256xf32, #tpu.memory_space<vmem>>, vector<1x256xf32>
    %18 = vector.broadcast %17 : vector<1x256xf32> to vector<8x256xf32>
    %19 = arith.mulf %16, %18 : vector<8x256xf32>
    %20 = vector.extract_strided_slice %3 {offsets = [0, 18], sizes = [8, 256], strides = [1, 1]} : vector<8x290xf32> to vector<8x256xf32>
    %c5 = arith.constant 5 : index
    %c0_7 = arith.constant 0 : index
    %21 = vector.load %arg6[%c5, %c0_7] : memref<9x256xf32, #tpu.memory_space<vmem>>, vector<1x256xf32>
    %22 = vector.broadcast %21 : vector<1x256xf32> to vector<8x256xf32>
    %23 = arith.mulf %20, %22 : vector<8x256xf32>
    %24 = vector.extract_strided_slice %3 {offsets = [0, 32], sizes = [8, 256], strides = [1, 1]} : vector<8x290xf32> to vector<8x256xf32>
    %c6 = arith.constant 6 : index
    %c0_8 = arith.constant 0 : index
    %25 = vector.load %arg6[%c6, %c0_8] : memref<9x256xf32, #tpu.memory_space<vmem>>, vector<1x256xf32>
    %26 = vector.broadcast %25 : vector<1x256xf32> to vector<8x256xf32>
    %27 = arith.mulf %24, %26 : vector<8x256xf32>
    %28 = vector.extract_strided_slice %3 {offsets = [0, 33], sizes = [8, 256], strides = [1, 1]} : vector<8x290xf32> to vector<8x256xf32>
    %c7 = arith.constant 7 : index
    %c0_9 = arith.constant 0 : index
    %29 = vector.load %arg6[%c7, %c0_9] : memref<9x256xf32, #tpu.memory_space<vmem>>, vector<1x256xf32>
    %30 = vector.broadcast %29 : vector<1x256xf32> to vector<8x256xf32>
    %31 = arith.mulf %28, %30 : vector<8x256xf32>
    %32 = vector.extract_strided_slice %3 {offsets = [0, 34], sizes = [8, 256], strides = [1, 1]} : vector<8x290xf32> to vector<8x256xf32>
    %c8 = arith.constant 8 : index
    %c0_10 = arith.constant 0 : index
    %33 = vector.load %arg6[%c8, %c0_10] : memref<9x256xf32, #tpu.memory_space<vmem>>, vector<1x256xf32>
    %34 = vector.broadcast %33 : vector<1x256xf32> to vector<8x256xf32>
    %35 = arith.mulf %32, %34 : vector<8x256xf32>
    %36 = tpu.concatenate %7, %11, %15, %19, %1, %23, %27, %31, %35 in 0 : vector<8x256xf32>, vector<8x256xf32>, vector<8x256xf32>, vector<8x256xf32>, vector<8x256xf32>, vector<8x256xf32>, vector<8x256xf32>, vector<8x256xf32>, vector<8x256xf32> -> vector<72x256xf32>
    %c0_11 = arith.constant 0 : index
    %c0_12 = arith.constant 0 : index
    %37 = vector.load %arg2[%c0_11, %c0_12] : memref<8x72xf32, #tpu.memory_space<vmem>>, vector<8x72xf32>
    %cst_13 = arith.constant dense<0.000000e+00> : vector<8x256xf32>
    %38 = tpu.matmul %37, %36, %cst_13 {dimension_numbers = #tpu.dot_dimension_numbers<[1], [0], [0], [1], [0, 0, 1, 1], [], []>} : vector<8x72xf32>, vector<72x256xf32>, vector<8x256xf32> -> vector<8x256xf32>
    %c0_14 = arith.constant 0 : index
    %c0_15 = arith.constant 0 : index
    %39 = vector.load %arg3[%c0_14, %c0_15] : memref<8x1xf32, #tpu.memory_space<vmem>>, vector<8x1xf32>
    %40 = vector.broadcast %39 : vector<8x1xf32> to vector<8x256xf32>
    %41 = arith.addf %38, %40 : vector<8x256xf32>
    %cst_16 = arith.constant 0.000000e+00 : f32
    %42 = vector.broadcast %cst_16 : f32 to vector<8x256xf32>
    %43 = arith.maximumf %41, %42 : vector<8x256xf32>
    %cst_17 = arith.constant 0.000000e+00 : f32
    %44 = vector.broadcast %cst_17 : f32 to vector<8x17xf32>
    %45 = tpu.concatenate %44, %43, %44 in 1 : vector<8x17xf32>, vector<8x256xf32>, vector<8x17xf32> -> vector<8x290xf32>
    %46 = vector.extract_strided_slice %45 {offsets = [0, 0], sizes = [8, 256], strides = [1, 1]} : vector<8x290xf32> to vector<8x256xf32>
    %c0_18 = arith.constant 0 : index
    %c0_19 = arith.constant 0 : index
    %47 = vector.load %arg6[%c0_18, %c0_19] : memref<9x256xf32, #tpu.memory_space<vmem>>, vector<1x256xf32>
    %48 = vector.broadcast %47 : vector<1x256xf32> to vector<8x256xf32>
    %49 = arith.mulf %46, %48 : vector<8x256xf32>
    %50 = vector.extract_strided_slice %45 {offsets = [0, 1], sizes = [8, 256], strides = [1, 1]} : vector<8x290xf32> to vector<8x256xf32>
    %c1_20 = arith.constant 1 : index
    %c0_21 = arith.constant 0 : index
    %51 = vector.load %arg6[%c1_20, %c0_21] : memref<9x256xf32, #tpu.memory_space<vmem>>, vector<1x256xf32>
    %52 = vector.broadcast %51 : vector<1x256xf32> to vector<8x256xf32>
    %53 = arith.mulf %50, %52 : vector<8x256xf32>
    %54 = vector.extract_strided_slice %45 {offsets = [0, 2], sizes = [8, 256], strides = [1, 1]} : vector<8x290xf32> to vector<8x256xf32>
    %c2_22 = arith.constant 2 : index
    %c0_23 = arith.constant 0 : index
    %55 = vector.load %arg6[%c2_22, %c0_23] : memref<9x256xf32, #tpu.memory_space<vmem>>, vector<1x256xf32>
    %56 = vector.broadcast %55 : vector<1x256xf32> to vector<8x256xf32>
    %57 = arith.mulf %54, %56 : vector<8x256xf32>
    %58 = vector.extract_strided_slice %45 {offsets = [0, 16], sizes = [8, 256], strides = [1, 1]} : vector<8x290xf32> to vector<8x256xf32>
    %c3_24 = arith.constant 3 : index
    %c0_25 = arith.constant 0 : index
    %59 = vector.load %arg6[%c3_24, %c0_25] : memref<9x256xf32, #tpu.memory_space<vmem>>, vector<1x256xf32>
    %60 = vector.broadcast %59 : vector<1x256xf32> to vector<8x256xf32>
    %61 = arith.mulf %58, %60 : vector<8x256xf32>
    %62 = vector.extract_strided_slice %45 {offsets = [0, 18], sizes = [8, 256], strides = [1, 1]} : vector<8x290xf32> to vector<8x256xf32>
    %c5_26 = arith.constant 5 : index
    %c0_27 = arith.constant 0 : index
    %63 = vector.load %arg6[%c5_26, %c0_27] : memref<9x256xf32, #tpu.memory_space<vmem>>, vector<1x256xf32>
    %64 = vector.broadcast %63 : vector<1x256xf32> to vector<8x256xf32>
    %65 = arith.mulf %62, %64 : vector<8x256xf32>
    %66 = vector.extract_strided_slice %45 {offsets = [0, 32], sizes = [8, 256], strides = [1, 1]} : vector<8x290xf32> to vector<8x256xf32>
    %c6_28 = arith.constant 6 : index
    %c0_29 = arith.constant 0 : index
    %67 = vector.load %arg6[%c6_28, %c0_29] : memref<9x256xf32, #tpu.memory_space<vmem>>, vector<1x256xf32>
    %68 = vector.broadcast %67 : vector<1x256xf32> to vector<8x256xf32>
    %69 = arith.mulf %66, %68 : vector<8x256xf32>
    %70 = vector.extract_strided_slice %45 {offsets = [0, 33], sizes = [8, 256], strides = [1, 1]} : vector<8x290xf32> to vector<8x256xf32>
    %c7_30 = arith.constant 7 : index
    %c0_31 = arith.constant 0 : index
    %71 = vector.load %arg6[%c7_30, %c0_31] : memref<9x256xf32, #tpu.memory_space<vmem>>, vector<1x256xf32>
    %72 = vector.broadcast %71 : vector<1x256xf32> to vector<8x256xf32>
    %73 = arith.mulf %70, %72 : vector<8x256xf32>
    %74 = vector.extract_strided_slice %45 {offsets = [0, 34], sizes = [8, 256], strides = [1, 1]} : vector<8x290xf32> to vector<8x256xf32>
    %c8_32 = arith.constant 8 : index
    %c0_33 = arith.constant 0 : index
    %75 = vector.load %arg6[%c8_32, %c0_33] : memref<9x256xf32, #tpu.memory_space<vmem>>, vector<1x256xf32>
    %76 = vector.broadcast %75 : vector<1x256xf32> to vector<8x256xf32>
    %77 = arith.mulf %74, %76 : vector<8x256xf32>
    %78 = tpu.concatenate %49, %53, %57, %61, %43, %65, %69, %73, %77 in 0 : vector<8x256xf32>, vector<8x256xf32>, vector<8x256xf32>, vector<8x256xf32>, vector<8x256xf32>, vector<8x256xf32>, vector<8x256xf32>, vector<8x256xf32>, vector<8x256xf32> -> vector<72x256xf32>
    %c0_34 = arith.constant 0 : index
    %c0_35 = arith.constant 0 : index
    %79 = vector.load %arg4[%c0_34, %c0_35] : memref<8x72xf32, #tpu.memory_space<vmem>>, vector<8x72xf32>
    %cst_36 = arith.constant dense<0.000000e+00> : vector<8x256xf32>
    %80 = tpu.matmul %79, %78, %cst_36 {dimension_numbers = #tpu.dot_dimension_numbers<[1], [0], [0], [1], [0, 0, 1, 1], [], []>} : vector<8x72xf32>, vector<72x256xf32>, vector<8x256xf32> -> vector<8x256xf32>
    %c0_37 = arith.constant 0 : index
    %c0_38 = arith.constant 0 : index
    %81 = vector.load %arg5[%c0_37, %c0_38] : memref<8x1xf32, #tpu.memory_space<vmem>>, vector<8x1xf32>
    %82 = vector.broadcast %81 : vector<8x1xf32> to vector<8x256xf32>
    %83 = arith.addf %80, %82 : vector<8x256xf32>
    %cst_39 = arith.constant 0.000000e+00 : f32
    %84 = vector.broadcast %cst_39 : f32 to vector<8x256xf32>
    %85 = arith.maximumf %83, %84 : vector<8x256xf32>
    %cst_40 = arith.constant 0.000000e+00 : f32
    %86 = vector.broadcast %cst_40 : f32 to vector<8x1xf32>
    %87 = tpu.concatenate %85, %86 in 1 : vector<8x256xf32>, vector<8x1xf32> -> vector<8x257xf32>
    %88 = vector.extract_strided_slice %87 {offsets = [0, 1], sizes = [8, 256], strides = [1, 1]} : vector<8x257xf32> to vector<8x256xf32>
    %89 = arith.maximumf %85, %88 : vector<8x256xf32>
    %cst_41 = arith.constant 0.000000e+00 : f32
    %90 = vector.broadcast %cst_41 : f32 to vector<8x16xf32>
    %91 = tpu.concatenate %89, %90 in 1 : vector<8x256xf32>, vector<8x16xf32> -> vector<8x272xf32>
    %92 = vector.extract_strided_slice %91 {offsets = [0, 16], sizes = [8, 256], strides = [1, 1]} : vector<8x272xf32> to vector<8x256xf32>
    %93 = arith.maximumf %89, %92 : vector<8x256xf32>
    %c0_42 = arith.constant 0 : index
    %c0_43 = arith.constant 0 : index
    %94 = vector.load %arg7[%c0_42, %c0_43] : memref<256x64xf32, #tpu.memory_space<vmem>>, vector<256x64xf32>
    %cst_44 = arith.constant dense<0.000000e+00> : vector<8x64xf32>
    %95 = tpu.matmul %93, %94, %cst_44 {dimension_numbers = #tpu.dot_dimension_numbers<[1], [0], [0], [1], [0, 0, 1, 1], [], []>} : vector<8x256xf32>, vector<256x64xf32>, vector<8x64xf32> -> vector<8x64xf32>
    %c0_45 = arith.constant 0 : index
    %c0_46 = arith.constant 0 : index
    %c0_47 = arith.constant 0 : index
    %96 = vector.load %arg8[%c0_45, %c0_46, %c0_47] : memref<1x8x64xf32, #tpu.memory_space<vmem>>, vector<1x8x64xf32>
    %97 = vector.shape_cast %96 : vector<1x8x64xf32> to vector<8x64xf32>
    %98 = vector.shape_cast %95 : vector<8x64xf32> to vector<1x8x64xf32>
    tpu.vector_store %arg8[%c0_45, %c0_46, %c0_47], %98 {strides = array<i32>} : memref<1x8x64xf32, #tpu.memory_space<vmem>>, vector<1x8x64xf32>,
    return
  }
  func.func @transform_0(%arg0: i32) -> (i32, i32, i32) {
    %c0_i32 = arith.constant 0 : i32
    %c0_i32_0 = arith.constant 0 : i32
    %c0_i32_1 = arith.constant 0 : i32
    return %arg0, %c0_i32, %c0_i32_0 : i32, i32, i32
  }
  func.func @transform_1(%arg0: i32) -> (i32, i32) {
    %c0_i32 = arith.constant 0 : i32
    %c0_i32_0 = arith.constant 0 : i32
    %c0_i32_1 = arith.constant 0 : i32
    return %c0_i32, %c0_i32_0 : i32, i32
  }
  func.func @transform_2(%arg0: i32) -> (i32, i32) {
    %c0_i32 = arith.constant 0 : i32
    %c0_i32_0 = arith.constant 0 : i32
    %c0_i32_1 = arith.constant 0 : i32
    return %c0_i32, %c0_i32_0 : i32, i32
  }
  func.func @transform_3(%arg0: i32) -> (i32, i32) {
    %c0_i32 = arith.constant 0 : i32
    %c0_i32_0 = arith.constant 0 : i32
    %c0_i32_1 = arith.constant 0 : i32
    return %c0_i32, %c0_i32_0 : i32, i32
  }
  func.func @transform_4(%arg0: i32) -> (i32, i32) {
    %c0_i32 = arith.constant 0 : i32
    %c0_i32_0 = arith.constant 0 : i32
    %c0_i32_1 = arith.constant 0 : i32
    return %c0_i32, %c0_i32_0 : i32, i32
  }
  func.func @transform_5(%arg0: i32) -> (i32, i32) {
    %c0_i32 = arith.constant 0 : i32
    %c0_i32_0 = arith.constant 0 : i32
    %c0_i32_1 = arith.constant 0 : i32
    return %c0_i32, %c0_i32_0 : i32, i32
  }
  func.func @transform_6(%arg0: i32) -> (i32, i32) {
    %c0_i32 = arith.constant 0 : i32
    %c0_i32_0 = arith.constant 0 : i32
    %c0_i32_1 = arith.constant 0 : i32
    return %c0_i32, %c0_i32_0 : i32, i32
  }
  func.func @transform_7(%arg0: i32) -> (i32, i32, i32) {
    %c0_i32 = arith.constant 0 : i32
    %c0_i32_0 = arith.constant 0 : i32
    %c0_i32_1 = arith.constant 0 : i32
    return %arg0, %c0_i32, %c0_i32_0 : i32, i32, i32
  }
}

</mosaic_0001>

<bundles_post_ra>
// kernel: tpu_custom_call.1
= control target key start
LH: loop header
LB: loop body
LE: loop exit
PB: predicated region body
PF: predicated region fallthrough
CT: control target
= control target key end

     0   :  { %12 = vsyncpa [#allocation3], 0  ;;  %s1939_s0 = inlined_call_operand.vmem [shape: f32[2,8,256], index: 0, kind: input, shape index: {}]   ;;  %s1940_s1 = inlined_call_operand.vmem [shape: f32[8,72], index: 1, kind: input, shape index: {}]   ;;  %s1941_s2 = inlined_call_operand.vmem [shape: f32[8,1], index: 2, kind: input, shape index: {}]   ;;  %s1942_s3 = inlined_call_operand.vmem [shape: f32[8,72], index: 3, kind: input, shape index: {}]   ;;  %s1943_s4 = inlined_call_operand.vmem [shape: f32[8,1], index: 4, kind: input, shape index: {}]   ;;  %s1944_s5 = inlined_call_operand.vmem [shape: f32[9,256], index: 5, kind: input, shape index: {}]   ;;  %s1945_s6 = inlined_call_operand.vmem [shape: f32[256,64], index: 6, kind: input, shape index: {}]   ;;  %s1946_s7 = inlined_call_operand.hbm [shape: f32[2,8,64], index: 7, kind: output, shape index: {}]  }
   0x1   :  { %14 = vsyncpa [#allocation3 + $0x1], 0  ;;  %s1434_s24 = smov 0   ;;  %s1436_s25 = smov 0  }
   0x2   :  { %s1438_s26 = smov 0   ;;  %s1440_s27 = smov 0  }
   0x3 LB: > { %s1455_s28 = sadd.s32 4294967295, %s1374_s27   ;;  %s1064_s29 = sadd.s32 4294967294, %s1374_s27   ;;  %s1374_s27 = sphi %s1440_s27, %s1952_s27   ;;  %s1370_s26 = sphi %s1438_s26, %s1951_s26   ;;  %s1366_s25 = sphi %s1436_s25, %s1950_s25   ;;  %s1362_s24 = sphi %s1434_s24, %s1949_s24  }
   0x4   : > { %s1459_s30 = sadd.s32 1, %s1374_s27   ;;  %s179_s8 = sadd.s32 1, %s1370_s26 }
   0x5   : > { %s176_s9 = ssub.s32 %s1374_s27, %s1459_s30  ;;  %p189_p0 = scmp.ne.s32.totalorder %s1370_s26, %s1366_s25 }
   0x6   : > { %p177_p1 = scmp.eq.s32.totalorder %s176_s9, 0  ;;  %p190_p2 = scmp.eq.s32.totalorder %s1455_s28, 1 }
   0x7   : > { %p195_p3 = scmp.ne.s32.totalorder %s1366_s25, %s1362_s24  ;;  %p196_p4 = scmp.eq.s32.totalorder %s1064_s29, 1 }
   0x8   : > { %s1470_s10 = scalar_select %p177_p1, %s1370_s26, %s179_s8  }
   0x9   : > { %p1472_p5 = por %p190_p2, %p189_p0  ;;  %p1476_p6 = por %p196_p4, %p195_p3 }
   0xa   : > { %p1067_p7 = scmp.ge.s32.totalorder %s1374_s27, 1  ;;  %p240_p8 = scmp.lt.s32.totalorder %s1374_s27, 3 }
   0xc   : > { %p241_p9 = pnand %p1067_p7, %p240_p8 }
   0xd   : > { %p272_p10 = scmp.lt.s32.totalorder (!%p241_p9), %s1455_s28, 1  ;;  %v294_v0 = vlaneseq (!%p241_p9)  ;;  %v1071_v2 = vld [vmem:[%s1944_s5 + $0x1] ss:$8 sm:$0x3] (!%p241_p9)  ;;  %s1376_s20 = smov (!%p241_p9), 17   ;;  %vm285_vm0 = vcmask (!%p241_p9), 138240  }
   0xe   : > { %244 = sbr.rel (%p241_p9) target bundleno = 1468 (0x5bc), region = 48  ;;  %s1377_s21 = smov (!%p241_p9), 1   ;;  %v1072_v9 = vld [vmem:[%s1944_s5 + $0x2] ss:$8 sm:$0x3] (!%p241_p9)  ;;  %vm321_vm1 = vcmask (!%p241_p9), 7168  }
   0xf   : > { %v295_v1 = vshrl.u32 (!%p241_p9), %v294_v0, 7  ;;  %v1073_v12 = vld [vmem:[%s1944_s5 + $0x3] ss:$8 sm:$0x3] (!%p241_p9)  ;;  %s1378_s9 = smov (!%p241_p9), 2   ;;  %s1379_s15 = smov (!%p241_p9), 16  }
  0x10   : > { %v1074_v15 = vld [vmem:[%s1944_s5 + $0x5] ss:$8 sm:$0x3] (!%p241_p9)  ;;  %v1075_v18 = vld [vmem:[%s1944_s5 + $0x6] ss:$8 sm:$0x3] (!%p241_p9) }
  0x11   : > { %v1487_v3 = vsub.s32 (!%p241_p9), 0, %v295_v1  ;;  %v1489_v4 = vsub.s32 (!%p241_p9), 1, %v295_v1  ;;  %s1380_s18 = smov (!%p241_p9), 18   ;;  %v1076_v21 = vld [vmem:[%s1944_s5 + $0x7] ss:$8 sm:$0x3] (!%p241_p9) }
  0x12   : > { %s1381_s22 = smov (!%p241_p9), 32   ;;  %v1077_v24 = vld [vmem:[%s1944_s5 + $0x10] ss:$8 sm:$0x3] (!%p241_p9)  ;;  %s1382_s8 = smov (!%p241_p9), 33   ;;  %vm344_vm2 = vcmask (!%p241_p9), 15360  }
  0x13   : > { %v312_v6 = vrot.slane (!%p241_p9), %v1071_v2, %v1487_v3  ;;  %v316_v7 = vrot.slane (!%p241_p9), %v1071_v2, %v1489_v4  ;;  %v335_v10 = vrot.slane (!%p241_p9), %v1072_v9, %v1487_v3  ;;  %v339_v11 = vrot.slane (!%p241_p9), %v1072_v9, %v1489_v4  ;;  %s1385_s14 = smov (!%p241_p9), 126   ;;  %s1388_s17 = smov (!%p241_p9), 96  }
  0x14   : > { %v358_v13 = vrot.slane (!%p241_p9), %v1073_v12, %v1487_v3  ;;  %v362_v14 = vrot.slane (!%p241_p9), %v1073_v12, %v1489_v4  ;;  %v381_v16 = vrot.slane (!%p241_p9), %v1074_v15, %v1487_v3  ;;  %v385_v17 = vrot.slane (!%p241_p9), %v1074_v15, %v1489_v4 }
  0x15   : > { %s273_s13 = scalar_select %p272_p10, %s1455_s28, 1  ;;  %317 = vrot.lane.b32.xlu1 %v312_v6, %s1377_s21  ;;  %v404_v19 = vrot.slane %v1075_v18, %v1487_v3  ;;  %v408_v20 = vrot.slane %v1075_v18, %v1489_v4  ;;  %v427_v22 = vrot.slane %v1076_v21, %v1487_v3  ;;  %v431_v23 = vrot.slane %v1076_v21, %v1489_v4 }
  0x16   : > { %v450_v25 = vrot.slane %v1077_v24, %v1487_v3  ;;  %v454_v26 = vrot.slane %v1077_v24, %v1489_v4  ;;  %vm367_vm3 = vcmask 130048   ;;  %vm390_vm4 = vcmask 146432  }
  0x17   : > { %s1084_s16 = sshll.u32 %s273_s13, 4  ;;  %s1384_s13 = smov 127   ;;  %vm413_vm5 = vcmask 261120   ;;  %vm436_vm6 = vcmask 269312   ;;  %vm459_vm7 = vcmask 277504   ;;  %v1389_v15 = vmov 0.0  }
  0x18   : > { %s276_s19 = scalar_lea.vmem %s1939_s0, %s1084_s16  ;;  %s1387_s16 = smov 110   ;;  %640 = vmatprep.mubr.f32.mxu1 %v1389_v15  ;;  %vm476_vm8 = vcmask 1039360   ;;  %vm490_vm9 = vcmask 1031168   ;;  %vm504_vm10 = vcmask 916480   ;;  %vm518_vm11 = vcmask 900096  }
  0x19   : > { %v1494_v5 = vld [vmem:[%s276_s19] sm:$0xff]  ;;  %v1500_v8 = vld [vmem:[%s276_s19 + $0x8] sm:$0xff]  ;;  %319 = vrot.lane.b32.xlu1 %v316_v7, %s1377_s21  ;;  %s1392_s19 = smov 94   ;;  %vm532_vm12 = vcmask 785408   ;;  %vm546_vm13 = vcmask 777216   ;;  %vm560_vm14 = vcmask 769024  }
  0x1a   : > { %281 = vrot.lane.b32.xlu0 %v1494_v5, %s1376_s20  ;;  %vm572_vm15 = vcmask 588800  }
  0x1d   : > { %342 = vrot.lane.b32.xlu1 %v339_v11, %s1378_s9 }
  0x1e   : > { %283 = vrot.lane.b32.xlu0 %v1500_v8, %s1376_s20 }
  0x21   : > { %365 = vrot.lane.b32.xlu1 %v362_v14, %s1379_s15 }
  0x22   : > { %340 = vrot.lane.b32.xlu0 %v335_v10, %s1378_s9  ;;  %s1383_s9 = smov 34  }
  0x25   : > { %388 = vrot.lane.b32.xlu1 %v385_v17, %s1380_s18  ;;  %v1391_v17 = vmov 0  }
  0x26   : > { %363 = vrot.lane.b32.xlu0 %v358_v13, %s1379_s15  ;;  %s1386_s15 = smov 112   ;;  %1270 = vset.pattern.permute.xlu1 %v1391_v17 }
  0x27   : > { %1311 = vset.pattern.permute.xlu0 %v1391_v17 }
  0x29   : > { %411 = vrot.lane.b32.xlu1 %v408_v20, %s1381_s22 }
  0x2a   : > { %386 = vrot.lane.b32.xlu0 %v381_v16, %s1380_s18  ;;  %s1390_s18 = smov 95  }
  0x2d   : > { %434 = vrot.lane.b32.xlu1 %v431_v23, %s1382_s8  ;;  %v292_v23 = vld [vmem:[%s1944_s5] ss:$8 sm:$0x3] }
  0x2e   : > { %409 = vrot.lane.b32.xlu0 %v404_v19, %s1381_s22  ;;  %s1081_s22 = sshll.u32 %s1455_s28, 7  ;;  %s1393_s28 = smov [#allocation2]  }
  0x31   : > { %457 = vrot.lane.b32.xlu1 %v454_v26, %s1383_s9  ;;  %v1664_v26 = vrot.slane %v292_v23, %v1489_v4 }
  0x32   : > { %432 = vrot.lane.b32.xlu0 %v427_v22, %s1382_s8  ;;  %v566_v22 = vld [vmem:[%s1941_s2] sm:$0xff] }
  0x36   : > { %455 = vrot.lane.b32.xlu0 %v450_v25, %s1383_s9  ;;  %s1897_s9 = scalar_lea.hbm %s1946_s7, %s1081_s22 }
  0x87   : > { %v1537_v29 = vpop.permute.xlu1 %317 }
  0x8b   : > { %v1542_v32 = vpop.permute.xlu1 %319 }
  0x8c   : > { %v282_v27 = vpop.permute.xlu0 %281  ;;  %v1552_v35 = vsel %vm321_vm1, %v1537_v29, %v1542_v32 }
  0x8d   : > { %v1535_v28 = vsel %vm285_vm0, 0.0, %v282_v27 }
  0x8e   : > { %v326_v30 = vmul.f32 %v1537_v29, %v1535_v28 }
  0x8f   : > { %v1562_v40 = vpop.permute.xlu1 %342 }
  0x90   : > { %470 = vrot.lane.b32.xlu1 %v326_v30, %s1384_s13  ;;  %v284_v31 = vpop.permute.xlu0 %283 }
  0x91   : > { %v1545_v33 = vsel %vm285_vm0, %v282_v27, %v284_v31  ;;  %v1548_v34 = vsel %vm285_vm0, %v284_v31, 0.0  ;;  %v1667_v27 = vrot.slane %v292_v23, %v1487_v3 }
  0x92   : > { %v327_v37 = vmul.f32 %v1552_v35, %v1545_v33  ;;  %v328_v38 = vmul.f32 %v1542_v32, %v1548_v34  ;;  %v351_v44 = vmul.f32 %v1562_v40, %v1548_v34 }
  0x93   : > { %v1577_v46 = vpop.permute.xlu1 %365 }
  0x94   : > { %v1554_v36 = vpop.permute.xlu0 %340  ;;  %v1240_v47 = vpack.i.bf16 %v328_v38, %v327_v37  ;;  %v374_v49 = vmul.f32 %v1577_v46, %v1548_v34  ;;  %v305_v38 = vmul.f32 %v1664_v26, %v1545_v33 }
  0x95   : > { %v349_v39 = vmul.f32 %v1554_v36, %v1535_v28  ;;  %v1566_v41 = vsel %vm344_vm2, %v1554_v36, %v1562_v40 }
  0x96   : > { %v350_v43 = vmul.f32 %v1566_v41, %v1545_v33 }
  0x97   : > { %484 = vrot.lane.b32.xlu0 %v349_v39, %s1385_s14  ;;  %v1591_v52 = vpop.permute.xlu1 %388  ;;  %v304_v39 = vmul.f32 %v1667_v27, %v1535_v28 }
  0x98   : > { %v1569_v42 = vpop.permute.xlu0 %363  ;;  %v1245_v53 = vpack.i.bf16 %v351_v44, %v350_v43  ;;  %v397_v59 = vmul.f32 %v1591_v52, %v1548_v34 }
  0x99   : > { %v372_v45 = vmul.f32 %v1569_v42, %v1535_v28  ;;  %v1581_v48 = vsel %vm367_vm3, %v1569_v42, %v1577_v46 }
  0x9a   : > { %v373_v50 = vmul.f32 %v1581_v48, %v1545_v33 }
  0x9b   : > { %1241 = vrot.lane.b32.xlu0 %v1240_v47, %s1384_s13  ;;  %498 = vrot.lane.b32.xlu1 %v372_v45, %s1386_s15  ;;  %v1609_v61 = vpop.permute.xlu1 %411 }
  0x9c   : > { %v1589_v51 = vpop.permute.xlu0 %386  ;;  %v1250_v54 = vpack.i.bf16 %v374_v49, %v373_v50  ;;  %v420_v1 = vmul.f32 %v1609_v61, %v1548_v34 }
  0x9d   : > { %v1595_v55 = vsel %vm390_vm4, %v1589_v51, %v1591_v52  ;;  %v395_v57 = vmul.f32 %v1589_v51, %v1535_v28 }
  0x9e   : > { %v396_v58 = vmul.f32 %v1595_v55, %v1545_v33 }
  0x9f   : > { %1246 = vrot.lane.b32.xlu0 %v1245_v53, %s1385_s14  ;;  %1251 = vrot.lane.b32.xlu1 %v1250_v54, %s1386_s15  ;;  %v1623_v2 = vpop.permute.xlu1 %434 }
  0xa0   : > { %v1599_v56 = vpop.permute.xlu0 %409  ;;  %v1255_v6 = vpack.i.bf16 %v397_v59, %v396_v58  ;;  %v443_v9 = vmul.f32 %v1623_v2, %v1548_v34 }
  0xa1   : > { %v418_v60 = vmul.f32 %v1599_v56, %v1535_v28  ;;  %v1613_v62 = vsel %vm413_vm5, %v1599_v56, %v1609_v61 }
  0xa2   : > { %v419_v0 = vmul.f32 %v1613_v62, %v1545_v33 }
  0xa3   : > { %512 = vrot.lane.b32.xlu1 %v395_v57, %s1387_s16  ;;  %526 = vrot.lane.b32.xlu0 %v418_v60, %s1388_s17  ;;  %v1636_v12 = vpop.permute.xlu1 %457 }
  0xa4   : > { %v1617_v63 = vpop.permute.xlu0 %432  ;;  %v1260_v13 = vpack.i.bf16 %v420_v1, %v419_v0  ;;  %v466_v21 = vmul.f32 %v1636_v12, %v1548_v34 }
  0xa5   : > { %v1627_v7 = vsel %vm436_vm6, %v1617_v63, %v1623_v2  ;;  %v441_v18 = vmul.f32 %v1617_v63, %v1535_v28 }
  0xa6   : > { %v442_v10 = vmul.f32 %v1627_v7, %v1545_v33 }
  0xa7   : > { %1256 = vrot.lane.b32.xlu0 %v1255_v6, %s1387_s16 }
  0xa8   : > { %v1634_v11 = vpop.permute.xlu0 %455  ;;  %v1265_v14 = vpack.i.bf16 %v443_v9, %v442_v10 }
  0xa9   : > { %v1641_v16 = vsel %vm459_vm7, %v1634_v11, %v1636_v12  ;;  %v464_v20 = vmul.f32 %v1634_v11, %v1535_v28 }
  0xaa   : > { %1266 = vrot.lane.b32.xlu1 %v1265_v14, %s1390_s18  ;;  %v465_v19 = vmul.f32 %v1641_v16, %v1545_v33 }
  0xab   : > { %1261 = vrot.lane.b32.xlu0 %v1260_v13, %s1388_s17 }
  0xae   : > { %540 = vrot.lane.b32.xlu1 %v441_v18, %s1390_s18 }
  0xaf   : > { %556 = vrot.lane.b32.xlu0 %v465_v19, %s1392_s19 }
  0xb2   : > { %558 = vrot.lane.b32.xlu1 %v466_v21, %s1392_s19 }
  0xb3   : > { %554 = vrot.lane.b32.xlu0 %v464_v20, %s1392_s19 }
  0xb6   : > { %569 = vperm.xlu1 %1270, %v566_v22  }
 0x102   : > { %v471_v24 = vpop.permute.xlu1 %470 }
 0x109   : > { %v485_v25 = vpop.permute.xlu0 %484 }
 0x10d   : > { %v499_v30 = vpop.permute.xlu1 %498  ;;  %v1242_v31 = vpop.permute.xlu0 %1241 }
 0x10e   : > { %v1244_v34 = vunpack.i.h.bf16 %v1242_v31  ;;  %v1243_v37 = vunpack.i.l.bf16 %v1242_v31 }
 0x110   : > { %v478_v43 = vsel %vm476_vm8, %v1243_v37, %v1244_v34  ;;  %v477_v44 = vsel %vm476_vm8, %v471_v24, %v1243_v37 }
 0x111   : > { %v1252_v4 = vpop.permute.xlu1 %1251  ;;  %v1247_v45 = vpop.permute.xlu0 %1246  ;;  %v1120_v47 = vpack.c.bf16 %v478_v43, %v305_v38  ;;  %v1122_v3 = vpack.c.bf16 %v477_v44, %v304_v39 }
 0x112   : > { %v1254_v49 = vunpack.i.h.bf16 %v1252_v4  ;;  %v1253_v50 = vunpack.i.l.bf16 %v1252_v4  ;;  %v1249_v53 = vunpack.i.h.bf16 %v1247_v45  ;;  %v1248_v54 = vunpack.i.l.bf16 %v1247_v45  ;;  %v565_v4 = vld [vmem:[%s1940_s1] sm:$0xff] }
 0x113   : > { %1121 = vmatprep.subr.bf16.mxu1 %v1120_v47 }
 0x114   : > { %1123 = vmatpush1.bf16.msra.mxu1 %v1122_v3  ;;  %v492_v33 = vsel %vm490_vm9, %v1248_v54, %v1249_v53  ;;  %v506_v28 = vsel %vm504_vm10, %v1253_v50, %v1254_v49  ;;  %v491_v57 = vsel %vm490_vm9, %v485_v25, %v1248_v54  ;;  %v505_v58 = vsel %vm504_vm10, %v499_v30, %v1253_v50 }
 0x115   : > { %v527_v59 = vpop.permute.xlu0 %526  ;;  %v1124_v60 = vpack.c.bf16 %v506_v28, %v492_v33  ;;  %v1126_v0 = vpack.c.bf16 %v505_v58, %v491_v57  ;;  %v513_v1 = vpop.permute.xlu1 %512 }
 0x117   : > { %1125 = vmatprep.subr.bf16.mxu1 %v1124_v60 }
 0x118   : > { %1127 = vmatpush1.bf16.msra.mxu1 %v1126_v0 }
 0x119   : > { %v1257_v6 = vpop.permute.xlu0 %1256 }
 0x11a   : > { %v1259_v9 = vunpack.i.h.bf16 %v1257_v6  ;;  %v1258_v10 = vunpack.i.l.bf16 %v1257_v6 }
 0x11c   : > { %v520_v13 = vsel %vm518_vm11, %v1258_v10, %v1259_v9  ;;  %v519_v14 = vsel %vm518_vm11, %v513_v1, %v1258_v10  ;;  %v1267_v17 = vpop.permute.xlu1 %1266 }
 0x11d   : > { %v1262_v18 = vpop.permute.xlu0 %1261  ;;  %v1128_v19 = vpack.c.bf16 %v520_v13, %v1500_v8  ;;  %v1130_v20 = vpack.c.bf16 %v519_v14, %v1494_v5  ;;  %v1269_v21 = vunpack.i.h.bf16 %v1267_v17  ;;  %v1268_v22 = vunpack.i.l.bf16 %v1267_v17 }
 0x11e   : > { %v1264_v23 = vunpack.i.h.bf16 %v1262_v18  ;;  %v1263_v24 = vunpack.i.l.bf16 %v1262_v18 }
 0x11f   : > { %1129 = vmatprep.subr.bf16.mxu1 %v1128_v19  ;;  %v548_v30 = vsel %vm546_vm13, %v1268_v22, %v1269_v21 }
 0x120   : > { %1131 = vmatpush1.bf16.msra.mxu1 %v1130_v20  ;;  %v534_v25 = vsel %vm532_vm12, %v1263_v24, %v1264_v23  ;;  %v541_v31 = vpop.permute.xlu1 %540  ;;  %v533_v38 = vsel %vm532_vm12, %v527_v59, %v1263_v24 }
 0x121   : > { %v557_v34 = vpop.permute.xlu0 %556  ;;  %v1132_v37 = vpack.c.bf16 %v548_v30, %v534_v25  ;;  %v547_v8 = vsel %vm546_vm13, %v541_v31, %v1268_v22 }
 0x122   : > { %v1134_v5 = vpack.c.bf16 %v547_v8, %v533_v38 }
 0x123   : > { %1133 = vmatprep.subr.bf16.mxu1 %v1132_v37 }
 0x124   : > { %v559_v39 = vpop.permute.xlu1 %558  ;;  %1135 = vmatpush1.bf16.msra.mxu1 %v1134_v5 }
 0x125   : > { %v555_v43 = vpop.permute.xlu0 %554  ;;  %v562_v44 = vsel %vm560_vm14, %v557_v34, %v559_v39 }
 0x126   : > { %592 = vmatprep.subr.mxu1 %v562_v44  ;;  %v561_v45 = vsel %vm560_vm14, %v555_v43, %v557_v34 }
 0x128   : > { %593 = vmatpush1.msra.mxu1 %v561_v45 }
 0x129   : > { %1078 = vmatmul.mubr.msk.f32.vlgmr.msra.gmra.mrb[0].mxu1 %vm572_vm15, %v565_v4 }
 0x12a   : > { %849 = vmatprep.mubr.f32.mxu1 %v1389_v15 }
 0x135   : > { %v570_v47 = vpop.permute.xlu1 %569 }
 0x1fc   : > { %v642_v3 = vpop.f32.mrb[0].mxu1 }
 0x1fd   : > { %v1694_v49 = vadd.f32 %v642_v3, %v570_v47  ;;  %v644_v50 = vpop.f32.mrb[1].mxu1 }
 0x1fe   : > { %v1696_v53 = vadd.f32 %v644_v50, %v570_v47 }
 0x1ff   : > { %v647_v54 = vmax.f32 %v1694_v49, 0.0 }
 0x200   : > { %v648_v33 = vmax.f32 %v1696_v53, 0.0 }
 0x201   : > { %651 = vrot.lane.b32.xlu0 %v647_v54, %s1376_s20 }
 0x202   : > { %653 = vrot.lane.b32.xlu1 %v648_v33, %s1376_s20 }
 0x273   : > { %v652_v28 = vpop.permute.xlu0 %651 }
 0x274   : > { %v659_v57 = vsel %vm285_vm0, 0.0, %v652_v28  ;;  %v654_v58 = vpop.permute.xlu1 %653 }
 0x275   : > { %v655_v59 = vsel %vm285_vm0, %v652_v28, %v654_v58  ;;  %v660_v60 = vsel %vm285_vm0, %v654_v58, 0.0  ;;  %v666_v0 = vmul.f32 %v659_v57, %v1554_v36  ;;  %v663_v1 = vmul.f32 %v659_v57, %v1537_v29 }
 0x276   : > { %v664_v6 = vmul.f32 %v655_v59, %v1552_v35  ;;  %v665_v9 = vmul.f32 %v660_v60, %v1542_v32  ;;  %v669_v10 = vmul.f32 %v659_v57, %v1569_v42  ;;  %v670_v14 = vmul.f32 %v655_v59, %v1581_v48 }
 0x277   : > { %700 = vrot.lane.b32.xlu0 %v666_v0, %s1385_s14  ;;  %687 = vrot.lane.b32.xlu1 %v663_v1, %s1384_s13  ;;  %v671_v17 = vmul.f32 %v660_v60, %v1577_v46  ;;  %v667_v18 = vmul.f32 %v655_v59, %v1566_v41  ;;  %v668_v36 = vmul.f32 %v660_v60, %v1562_v40  ;;  %vm989_vm0 = vcmask 523264  }
 0x278   : > { %v1271_v13 = vpack.i.bf16 %v665_v9, %v664_v6  ;;  %v672_v35 = vmul.f32 %v659_v57, %v1589_v51  ;;  %v675_v42 = vmul.f32 %v659_v57, %v1599_v56  ;;  %v679_v46 = vmul.f32 %v655_v59, %v1627_v7 }
 0x279   : > { %v1281_v29 = vpack.i.bf16 %v671_v17, %v670_v14  ;;  %v1276_v32 = vpack.i.bf16 %v668_v36, %v667_v18  ;;  %v680_v41 = vmul.f32 %v660_v60, %v1623_v2  ;;  %v673_v40 = vmul.f32 %v655_v59, %v1595_v55 }
 0x27a   : > { %v674_v48 = vmul.f32 %v660_v60, %v1591_v52  ;;  %v676_v21 = vmul.f32 %v655_v59, %v1613_v62  ;;  %v677_v51 = vmul.f32 %v660_v60, %v1609_v61  ;;  %v678_v56 = vmul.f32 %v659_v57, %v1617_v63  ;;  %v776_v61 = vld [vmem:[%s1943_s4] sm:$0xff] }
 0x27b   : > { %713 = vrot.lane.b32.xlu1 %v669_v10, %s1386_s15  ;;  %1272 = vrot.lane.b32.xlu0 %v1271_v13, %s1384_s13  ;;  %v1296_v19 = vpack.i.bf16 %v680_v41, %v679_v46  ;;  %v683_v52 = vmul.f32 %v660_v60, %v1636_v12  ;;  %v682_v55 = vmul.f32 %v655_v59, %v1641_v16 }
 0x27c   : > { %v1286_v20 = vpack.i.bf16 %v674_v48, %v673_v40  ;;  %v1291_v2 = vpack.i.bf16 %v677_v51, %v676_v21  ;;  %v681_v62 = vmul.f32 %v659_v57, %v1634_v11  ;;  %v661_v16 = vmul.f32 %v659_v57, %v1667_v27  ;;  %v775_v40 = vld [vmem:[%s1942_s3] sm:$0xff] }
 0x27d   : > { %v662_v25 = vmul.f32 %v655_v59, %v1664_v26 }
 0x27f   : > { %1282 = vrot.lane.b32.xlu1 %v1281_v29, %s1386_s15  ;;  %1277 = vrot.lane.b32.xlu0 %v1276_v32, %s1385_s14  ;;  %s1316_s14 = sshll.u32 %s1393_s28, 4  ;;  %s1317_s14 = int_to_ptr.vmem [resolvable:$false] %s1316_s14 }
 0x283   : > { %726 = vrot.lane.b32.xlu1 %v672_v35, %s1387_s16  ;;  %739 = vrot.lane.b32.xlu0 %v675_v42, %s1388_s17 }
 0x287   : > { %1297 = vrot.lane.b32.xlu1 %v1296_v19, %s1390_s18  ;;  %1287 = vrot.lane.b32.xlu0 %v1286_v20, %s1387_s16  ;;  %s1318_s16 = scalar_lea.vmem %s1317_s14, 256 }
 0x28b   : > { %752 = vrot.lane.b32.xlu1 %v678_v56, %s1390_s18  ;;  %1292 = vrot.lane.b32.xlu0 %v1291_v2, %s1388_s17  ;;  %v903_v56 = vld [vmem:[%s1945_s6 + $0x80] sm:$0xff]  ;;  %v904_v2 = vld [vmem:[%s1945_s6 + $0x88] sm:$0xff] }
 0x28f   : > { %769 = vrot.lane.b32.xlu1 %v683_v52, %s1392_s19  ;;  %767 = vrot.lane.b32.xlu0 %v682_v55, %s1392_s19  ;;  %v887_v52 = vld [vmem:[%s1945_s6] sm:$0xff] }
 0x293   : > { %779 = vperm.xlu1 %1270, %v776_v61   ;;  %765 = vrot.lane.b32.xlu0 %v681_v62, %s1392_s19  ;;  %v1152_v61 = vpack.c.bf16 %v904_v2, %v903_v56  ;;  %v888_v62 = vld [vmem:[%s1945_s6 + $0x8] sm:$0xff]  ;;  %s269_s19 = sand.u32 1, %s1366_s25  }
 0x294   : > { %s1068_s21 = sshll.u32 %s269_s19, 3 }
 0x295   : > { %1153 = vmatprep.subr.bf16.mxu0 %v1152_v61  ;;  %s271_s23 = scalar_lea.vmem [#allocation2], %s1068_s21 }
 0x296   : > { %s1005_s29 = sshll.u32 %s271_s23, 4  ;;  %s1899_s29 = int_to_ptr.vmem [resolvable:$true] %s1005_s29 }
 0x297   : > { %s1312_s20 = scalar_lea.vmem %s1899_s29, 128  ;;  %p1319_p0 = scmp.lt.s32.totalorder %s1899_s29, %s1317_s14 }
 0x298   : > { %p1313_p11 = scmp.ne.s32.totalorder %s1899_s29, %s1312_s20  ;;  %p1320_p1 = scmp.lt.s32.totalorder %s1318_s16, %s1312_s20 }
 0x29a   : > { %p1314_p12 = pnand %p1313_p11, %p1472_p5  ;;  %p1321_p2 = por %p1320_p1, %p1319_p0 }
 0x29c   : > { %p1315_p13 = pneg %p1314_p12 }
 0x29e   : > { %p1322_p3 = pnand %p1321_p2, %p1315_p13 }
 0x2e9   : > { %v701_v63 = vpop.permute.xlu0 %700  ;;  %v688_v7 = vpop.permute.xlu1 %687 }
 0x2ed   : > { %v714_v22 = vpop.permute.xlu1 %713  ;;  %v1273_v23 = vpop.permute.xlu0 %1272 }
 0x2ee   : > { %v1275_v12 = vunpack.i.h.bf16 %v1273_v23  ;;  %v1274_v24 = vunpack.i.l.bf16 %v1273_v23  ;;  %v1154_v23 = vpack.c.bf16 %v888_v62, %v887_v52 }
 0x2f0   : > { %v693_v30 = vsel %vm476_vm8, %v688_v7, %v1274_v24  ;;  %v694_v31 = vsel %vm476_vm8, %v1274_v24, %v1275_v12  ;;  %v906_v7 = vld [vmem:[%s1945_s6 + $0x98] sm:$0xff]  ;;  %v889_v24 = vld [vmem:[%s1945_s6 + $0x10] sm:$0xff]  ;;  %1155 = vmatpush3.bf16.msra.mxu0 %v1154_v23 }
 0x2f1   : > { %v1138_v34 = vpack.c.bf16 %v693_v30, %v661_v16  ;;  %v1283_v37 = vpop.permute.xlu1 %1282  ;;  %v1278_v11 = vpop.permute.xlu0 %1277  ;;  %v1136_v38 = vpack.c.bf16 %v694_v31, %v662_v25  ;;  %v890_v16 = vld [vmem:[%s1945_s6 + $0x18] sm:$0xff]  ;;  %v907_v25 = vld [vmem:[%s1945_s6 + $0xa0] sm:$0xff]  ;;  %v908_v30 = vld [vmem:[%s1945_s6 + $0xa8] sm:$0xff] }
 0x2f2   : > { %v1285_v8 = vunpack.i.h.bf16 %v1283_v37  ;;  %v1284_v5 = vunpack.i.l.bf16 %v1283_v37  ;;  %v1280_v39 = vunpack.i.h.bf16 %v1278_v11  ;;  %v1279_v43 = vunpack.i.l.bf16 %v1278_v11  ;;  %v891_v11 = vld [vmem:[%s1945_s6 + $0x20] sm:$0xff] }
 0x2f3   : > { %1137 = vmatprep.subr.bf16.mxu1 %v1136_v38  ;;  %v1160_v37 = vpack.c.bf16 %v908_v30, %v907_v25  ;;  %v892_v38 = vld [vmem:[%s1945_s6 + $0x28] sm:$0xff] }
 0x2f4   : > { %v719_v44 = vsel %vm504_vm10, %v714_v22, %v1284_v5  ;;  %v706_v4 = vsel %vm490_vm9, %v701_v63, %v1279_v43  ;;  %1139 = vmatpush1.bf16.msra.mxu1 %v1138_v34  ;;  %v707_v26 = vsel %vm490_vm9, %v1279_v43, %v1280_v39  ;;  %v720_v27 = vsel %vm504_vm10, %v1284_v5, %v1285_v8  ;;  %v905_v63 = vld [vmem:[%s1945_s6 + $0x90] sm:$0xff]  ;;  %v910_v5 = vld [vmem:[%s1945_s6 + $0xb8] sm:$0xff] }
 0x2f5   : > { %v1142_v45 = vpack.c.bf16 %v719_v44, %v706_v4  ;;  %v727_v47 = vpop.permute.xlu1 %726  ;;  %v740_v3 = vpop.permute.xlu0 %739  ;;  %v1140_v50 = vpack.c.bf16 %v720_v27, %v707_v26  ;;  %v1156_v12 = vpack.c.bf16 %v906_v7, %v905_v63  ;;  %v1158_v34 = vpack.c.bf16 %v890_v16, %v889_v24  ;;  %v909_v8 = vld [vmem:[%s1945_s6 + $0xb0] sm:$0xff]  ;;  %v894_v4 = vld [vmem:[%s1945_s6 + $0x38] sm:$0xff]  ;;  %v911_v26 = vld [vmem:[%s1945_s6 + $0xc0] sm:$0xff] }
 0x2f6   : > { %v1162_v39 = vpack.c.bf16 %v892_v38, %v891_v11  ;;  %v1164_v43 = vpack.c.bf16 %v910_v5, %v909_v8  ;;  %v893_v44 = vld [vmem:[%s1945_s6 + $0x30] sm:$0xff]  ;;  %v912_v27 = vld [vmem:[%s1945_s6 + $0xc8] sm:$0xff] }
 0x2f7   : > { %1141 = vmatprep.subr.bf16.mxu1 %v1140_v50  ;;  %1157 = vmatprep.subr.bf16.mxu0 %v1156_v12  ;;  %v896_v50 = vld [vmem:[%s1945_s6 + $0x48] sm:$0xff] }
 0x2f8   : > { %1143 = vmatpush1.bf16.msra.mxu1 %v1142_v45  ;;  %1159 = vmatpush3.bf16.msra.mxu0 %v1158_v34  ;;  %v1166_v45 = vpack.c.bf16 %v894_v4, %v893_v44 }
 0x2f9   : > { %v1298_v28 = vpop.permute.xlu1 %1297  ;;  %v1288_v57 = vpop.permute.xlu0 %1287  ;;  %1161 = vmatprep.subr.bf16.mxu0 %v1160_v37 }
 0x2fa   : > { %v1290_v58 = vunpack.i.h.bf16 %v1288_v57  ;;  %v1289_v59 = vunpack.i.l.bf16 %v1288_v57  ;;  %v1300_v60 = vunpack.i.h.bf16 %v1298_v28  ;;  %v1299_v0 = vunpack.i.l.bf16 %v1298_v28  ;;  %v913_v28 = vld [vmem:[%s1945_s6 + $0xd0] sm:$0xff]  ;;  %v914_v57 = vld [vmem:[%s1945_s6 + $0xd8] sm:$0xff] }
 0x2fc   : > { %v732_v1 = vsel %vm518_vm11, %v727_v47, %v1289_v59  ;;  %v733_v6 = vsel %vm518_vm11, %v1289_v59, %v1290_v58  ;;  %v759_v35 = vsel %vm546_vm13, %v1299_v0, %v1300_v60  ;;  %1163 = vmatpush3.bf16.msra.mxu0 %v1162_v39  ;;  %v1168_v47 = vpack.c.bf16 %v912_v27, %v911_v26  ;;  %v897_v60 = vld [vmem:[%s1945_s6 + $0x50] sm:$0xff] }
 0x2fd   : > { %v1146_v9 = vpack.c.bf16 %v732_v1, %v647_v54  ;;  %v753_v10 = vpop.permute.xlu1 %752  ;;  %v1293_v13 = vpop.permute.xlu0 %1292  ;;  %v1144_v14 = vpack.c.bf16 %v733_v6, %v648_v33  ;;  %1165 = vmatprep.subr.bf16.mxu0 %v1164_v43  ;;  %v1172_v59 = vpack.c.bf16 %v914_v57, %v913_v28  ;;  %v915_v6 = vld [vmem:[%s1945_s6 + $0xe0] sm:$0xff] }
 0x2fe   : > { %v1295_v17 = vunpack.i.h.bf16 %v1293_v13  ;;  %v1294_v18 = vunpack.i.l.bf16 %v1293_v13  ;;  %v758_v36 = vsel %vm546_vm13, %v753_v10, %v1299_v0  ;;  %v898_v0 = vld [vmem:[%s1945_s6 + $0x58] sm:$0xff]  ;;  %v899_v10 = vld [vmem:[%s1945_s6 + $0x60] sm:$0xff] }
 0x2ff   : > { %1145 = vmatprep.subr.bf16.mxu1 %v1144_v14  ;;  %v1174_v1 = vpack.c.bf16 %v898_v0, %v897_v60  ;;  %v900_v14 = vld [vmem:[%s1945_s6 + $0x68] sm:$0xff] }
 0x300   : > { %v745_v29 = vsel %vm532_vm12, %v740_v3, %v1294_v18  ;;  %1147 = vmatpush1.bf16.msra.mxu1 %v1146_v9  ;;  %v746_v32 = vsel %vm532_vm12, %v1294_v18, %v1295_v17  ;;  %v895_v3 = vld [vmem:[%s1945_s6 + $0x40] sm:$0xff]  ;;  %1167 = vmatpush3.bf16.msra.mxu0 %v1166_v45  ;;  %v916_v9 = vld [vmem:[%s1945_s6 + $0xe8] sm:$0xff]  ;;  %v1178_v17 = vpack.c.bf16 %v900_v14, %v899_v10  ;;  %v917_v18 = vld [vmem:[%s1945_s6 + $0xf0] sm:$0xff] }
 0x301   : > { %v1150_v42 = vpack.c.bf16 %v758_v36, %v745_v29  ;;  %v770_v49 = vpop.permute.xlu1 %769  ;;  %v768_v54 = vpop.permute.xlu0 %767  ;;  %v1148_v46 = vpack.c.bf16 %v759_v35, %v746_v32  ;;  %v1170_v58 = vpack.c.bf16 %v896_v50, %v895_v3  ;;  %1169 = vmatprep.subr.bf16.mxu0 %v1168_v47  ;;  %v1176_v13 = vpack.c.bf16 %v916_v9, %v915_v6  ;;  %v918_v36 = vld [vmem:[%s1945_s6 + $0xf8] sm:$0xff]  ;;  %v901_v29 = vld [vmem:[%s1945_s6 + $0x70] sm:$0xff] }
 0x302   : > { %v772_v53 = vsel %vm560_vm14, %v768_v54, %v770_v49  ;;  %v1180_v32 = vpack.c.bf16 %v918_v36, %v917_v18  ;;  %v902_v35 = vld [vmem:[%s1945_s6 + $0x78] sm:$0xff] }
 0x303   : > { %1149 = vmatprep.subr.bf16.mxu1 %v1148_v46 }
 0x304   : > { %1151 = vmatpush1.bf16.msra.mxu1 %v1150_v42  ;;  %1171 = vmatpush3.bf16.msra.mxu0 %v1170_v58  ;;  %v1182_v42 = vpack.c.bf16 %v902_v35, %v901_v29 }
 0x305   : > { %v766_v33 = vpop.permute.xlu0 %765  ;;  %801 = vmatprep.subr.mxu1 %v772_v53  ;;  %1173 = vmatprep.subr.bf16.mxu0 %v1172_v59 }
 0x306   : > { %v771_v41 = vsel %vm560_vm14, %v766_v33, %v768_v54 }
 0x308   : > { %802 = vmatpush1.msra.mxu1 %v771_v41  ;;  %1175 = vmatpush3.bf16.msra.mxu0 %v1174_v1 }
 0x309   : > { %1079 = vmatmul.mubr.msk.f32.vlgmr.msra.gmra.mrb[2].mxu1 %vm572_vm15, %v775_v40  ;;  %1177 = vmatprep.subr.bf16.mxu0 %v1176_v13 }
 0x30c   : > { %1179 = vmatpush3.bf16.msra.mxu0 %v1178_v17 }
 0x30d   : > { %1181 = vmatprep.subr.bf16.mxu0 %v1180_v32 }
 0x310   : > { %1183 = vmatpush3.bf16.msra.mxu0 %v1182_v42 }
 0x312   : > { %v780_v48 = vpop.permute.xlu1 %779 }
 0x3dc   : > { %v851_v19 = vpop.f32.mrb[2].mxu1 }
 0x3dd   : > { %v1772_v20 = vadd.f32 %v851_v19, %v780_v48  ;;  %v853_v21 = vpop.f32.mrb[3].mxu1 }
 0x3de   : > { %v1774_v51 = vadd.f32 %v853_v21, %v780_v48 }
 0x3df   : > { %v856_v55 = vmax.f32 %v1772_v20, 0.0 }
 0x3e0   : > { %v857_v22 = vmax.f32 %v1774_v51, 0.0 }
 0x3e1   : > { %861 = vrot.lane.b32.xlu1 %v856_v55, %s1384_s13 }
 0x3e2   : > { %v1301_v31 = vpack.i.bf16 %v1389_v15, %v857_v22 }
 0x3e4   : > { %1302 = vrot.lane.b32.xlu0 %v1301_v31, %s1384_s13  ;;  %s992_s13 = scalar_lea.sflag [#allocation3], %s269_s19 }
 0x453   : > { %v862_v53 = vpop.permute.xlu1 %861 }
 0x456   : > { %v1303_v49 = vpop.permute.xlu0 %1302 }
 0x457   : > { %v1305_v54 = vunpack.i.h.bf16 %v1303_v49  ;;  %v1304_v46 = vunpack.i.l.bf16 %v1303_v49 }
 0x459   : > { %v868_v33 = vsel %vm476_vm8, %v1304_v46, %v1305_v54  ;;  %v867_v41 = vsel %vm476_vm8, %v862_v53, %v1304_v46 }
 0x45a   : > { %v871_v40 = vmax.f32 %v856_v55, %v867_v41  ;;  %v872_v48 = vmax.f32 %v857_v22, %v868_v33 }
 0x45c   : > { %875 = vrot.lane.b32.xlu1 %v871_v40, %s1386_s15  ;;  %v1306_v19 = vpack.i.bf16 %v1389_v15, %v872_v48 }
 0x45e   : > { %1307 = vrot.lane.b32.xlu0 %v1306_v19, %s1386_s15 }
 0x4ce   : > { %v876_v52 = vpop.permute.xlu1 %875 }
 0x4d0   : > { %v1308_v21 = vpop.permute.xlu0 %1307 }
 0x4d1   : > { %v1310_v56 = vunpack.i.h.bf16 %v1308_v21  ;;  %v1309_v2 = vunpack.i.l.bf16 %v1308_v21 }
 0x4d3   : > { %v882_v61 = vsel %vm504_vm10, %v1309_v2, %v1310_v56  ;;  %v881_v20 = vsel %vm504_vm10, %v876_v52, %v1309_v2 }
 0x4d4   : > { %v886_v62 = vmax.f32 %v872_v48, %v882_v61  ;;  %v885_v55 = vmax.f32 %v871_v40, %v881_v20 }
 0x4d6   : > { %983 = vmatprep.mubr.f32.mxu0 %v886_v62 }
 0x4d7   : > { %984 = vmatmul.mubr.f32.vlgmr.msra.gmra.mrb[0].mxu0 %v885_v55 }
 0x5aa   : > { %v1117_v15 = vpop.f32.mrb[0].mxu0 }
 0x5ab   : > { %v1118_v51 = vpop.f32.mrb[1].mxu0 }
 0x5ac   : > { %v1119_v63 = vadd.f32 %v1118_v51, %v1117_v15 }
 0x5ae   : > { %990 = vst.msk [vmem:[%s271_s23] sm:$0xff] %vm989_vm0, %v1119_v63 }
 0x5af   : > { %1325 = shalt.err (!%p1322_p3)
}
 0x5b0   : > { %s1326_s17 = scalar_lea.hbm %s1897_s9, 128  ;;  %s1330_s21 = scalar_lea.hbm %s1946_s7, 256 }
 0x5b1   : > { %p1327_p4 = scmp.ne.s32.totalorder %s1897_s9, %s1326_s17  ;;  %p1331_p9 = scmp.lt.u32.totalorder %s1897_s9, %s1946_s7 }
 0x5b2   : > { %p1332_p10 = scmp.lt.u32.totalorder %s1330_s21, %s1326_s17  ;;  %p1334_p12 = scmp.lt.u32.totalorder %s1326_s17, %s1897_s9 }
 0x5b3   : > { %p1328_p7 = pnand %p1327_p4, %p1472_p5 }
 0x5b4   : > { %p1333_p11 = por %p1332_p10, %p1331_p9 }
 0x5b5   : > { %p1329_p8 = pneg %p1328_p7 }
 0x5b6   : > { %p1335_p13 = por %p1334_p12, %p1333_p11 }
 0x5b8   : > { %p1336_p0 = pnand %p1335_p13, %p1329_p8 }
 0x5ba   : > { %1339 = shalt.err (!%p1336_p0)
}
 0x5bb   : > { %1184 = dma.vmem_to_hbm [thread:$0]  (%p1472_p5), %s1899_s29, 128, %s1897_s9, %s992_s13  }
 0x5bc PF: > { %p1190_p1 = scmp.ge.s32.totalorder %s1374_s27, 2  ;;  %s1017_s15 = sand.u32 1, %s1362_s24  }
 0x5bd   : > { %s1018_s8 = scalar_lea.sflag [#allocation3], %s1017_s15 }
 0x5be   : > { %p1187_p2 = pnand %p1190_p1, %p1476_p6 }
 0x5c0   : > { %1357 = dma.done.wait (!%p1187_p2), %s1018_s8, 128  }
 0x5c1   : > { %1359 = vsyncadd (!%p1187_p2), %s1018_s8, 4294967168  ;;  %p17_p3 = scmp.ge.s32.totalorder %s1459_s30, 4   ;;  %s1949_s24 = smov %s1366_s25 }
 0x5c2   : > { %s1950_s25 = smov %s1370_s26  ;;  %s1951_s26 = smov %s1470_s10 }
 0x5c3   : > { %s1952_s27 = smov %s1459_s30  ;;  %19 = sbr.rel (!%p17_p3) target bundleno = 3 (0x3), region = 90 }
 0x5ca   :  { %1023 = vsyncpa [#allocation3], 1 }
 0x5cb   :  { %1025 = vsyncpa [#allocation3 + $0x1], 1 }

</bundles_post_ra>
